<compile_context>
chip_gen: v7x
topology: tpu7x:2x2x1
jax: 0.10.0
libtpu: 0.0.40
codegen_flags: <defaults>
</compile_context>

<pallas_src>
import functools
import math

import jax
import jax.numpy as jnp
from jax.experimental import pallas as pl
from jax.experimental.pallas import tpu as pltpu


def _fused_kernel(topic_ref, glob_ref, mask_ref, w_all_ref, out_ref, *,
                  batch, n_topic, n_glob, num_heads, head_dim):
    """One kernel invocation == the whole (batch, heads) problem."""
    HD = num_heads * head_dim

    # --- single fused projection -------------------------------------------
    # rows = [topic ; glob], cols = [Wq_0..Wq_{H-1} | Wt_... | Wk_... | Wv_...]
    x = jnp.concatenate([topic_ref[...], glob_ref[...]], axis=0)   # (B*Nt+B*Ng, D) bf16
    proj = jnp.dot(x, w_all_ref[...],
                   preferred_element_type=jnp.float32)             # (rows, 4*HD) f32

    nt_rows = batch * n_topic
    proj_t = proj[:nt_rows]                                        # topic rows
    proj_g = proj[nt_rows:]                                        # glob rows

    tp_all = proj_t[:, HD:2 * HD].reshape(batch, n_topic, HD)      # topic projection

    # --- mask -> additive bias, hoisted out of the head loop ----------------
    # mask convention: 1.0 == masked (padded) key position.
    bias = jnp.where(mask_ref[...] > 0.5, jnp.float32(-1e9), jnp.float32(0.0))
    bias = jnp.broadcast_to(bias, (batch, n_topic, n_glob))        # (B, Nt, Ng)

    inv_sqrt_dh = jnp.float32(1.0 / math.sqrt(head_dim))

    # --- per-head attention, batched over the batch axis --------------------
    gl_cols = []
    for h in range(num_heads):                                     # static unroll, H small
        q = proj_t[:, h * head_dim:(h + 1) * head_dim]
        q = q.reshape(batch, n_topic, head_dim)                    # (B, Nt, Dh)
        k = proj_g[:, 2 * HD + h * head_dim:2 * HD + (h + 1) * head_dim]
        k = k.reshape(batch, n_glob, head_dim)                     # (B, Ng, Dh)
        v = proj_g[:, 3 * HD + h * head_dim:3 * HD + (h + 1) * head_dim]
        v = v.reshape(batch, n_glob, head_dim)                     # (B, Ng, Dh)

        s = jnp.einsum('bnd,bmd->bnm', q, k,
                       preferred_element_type=jnp.float32) * inv_sqrt_dh + bias
        s_max = jnp.max(s, axis=-1, keepdims=True)
        p = jnp.exp(s - s_max)
        denom = jnp.sum(p, axis=-1, keepdims=True)
        p = p * pl.reciprocal(denom, approx=False)                 # exact softmax

        gl_cols.append(jnp.einsum('bnm,bmd->bnd', p, v,
                                  preferred_element_type=jnp.float32))

    # One lane-dense 2*HD (=128) wide store: [gl_0..gl_{H-1} | tp_0..tp_{H-1}]
    out = jnp.concatenate(gl_cols + [tp_all], axis=-1)             # (B, Nt, 2*HD)
    out_ref[...] = out.astype(out_ref.dtype)


def multi_head_layer(topic, glob, mask, wq, wk, wv, wt):
    """Pallas implementation of MultiHeadLayer.forward (eval mode).

    topic: (B, Nt, D)   glob: (B, Ng, D)   mask: (B, Ng)  (1.0 == masked key)
    wq/wk/wv/wt: (H, D, Dh)
    Returns (gl, topic_out), each (B, Nt, H*Dh) == torch.cat(heads, dim=-1).
    """
    B, Nt, D = topic.shape
    _, Ng, _ = glob.shape
    H, _, Dh = wq.shape
    HD = H * Dh

    # Pack the four per-head weight stacks into one lane-dense bf16 slab
    # (D, 4*H*Dh): [Wq heads | Wt heads | Wk heads | Wv heads].  In a real
    # deployment this packing happens once at weight-load time.
    def _cat(w):                       # (H, D, Dh) -> (D, H*Dh), head-major cols
        return jnp.transpose(w, (1, 0, 2)).reshape(D, HD)

    w_all = jnp.concatenate([_cat(wq), _cat(wt), _cat(wk), _cat(wv)],
                            axis=-1).astype(jnp.bfloat16)          # (D, 4*HD)

    topic2 = topic.reshape(B * Nt, D).astype(jnp.bfloat16)         # bf16 MXU operands
    glob2 = glob.reshape(B * Ng, D).astype(jnp.bfloat16)
    mask3 = mask.reshape(B, 1, Ng).astype(jnp.float32)

    out = pl.pallas_call(
        functools.partial(_fused_kernel, batch=B, n_topic=Nt, n_glob=Ng,
                          num_heads=H, head_dim=Dh),
        out_shape=jax.ShapeDtypeStruct((B, Nt, 2 * HD), jnp.float32),
        # Whole problem in one step: every operand is a full-array VMEM block.
        in_specs=[
            pl.BlockSpec(memory_space=pltpu.MemorySpace.VMEM),     # topic rows (bf16)
            pl.BlockSpec(memory_space=pltpu.MemorySpace.VMEM),     # glob rows  (bf16)
            pl.BlockSpec(memory_space=pltpu.MemorySpace.VMEM),     # mask
            pl.BlockSpec(memory_space=pltpu.MemorySpace.VMEM),     # packed weights (bf16)
        ],
        out_specs=pl.BlockSpec(memory_space=pltpu.MemorySpace.VMEM),
    )(topic2, glob2, mask3, w_all)

    gl = out[:, :, :HD]     # == torch.cat(gl_out, dim=-1)
    tp = out[:, :, HD:]     # == torch.cat(topic_out, dim=-1)
    return gl, tp


def _reference(topic, glob, mask, wq, wk, wv, wt, matmul_dtype=jnp.float32):
    """Pure-JAX reference.  `matmul_dtype` controls the projection-matmul
    operand precision so the kernel (bf16 MXU operands, f32 accumulation) can
    be checked tightly against an identically-rounded reference."""
    H, D, Dh = wq.shape
    t = topic.astype(matmul_dtype)
    g = glob.astype(matmul_dtype)
    gl_heads, tp_heads = [], []
    for h in range(H):
        q = jnp.dot(t, wq[h].astype(matmul_dtype), preferred_element_type=jnp.float32)
        k = jnp.dot(g, wk[h].astype(matmul_dtype), preferred_element_type=jnp.float32)
        v = jnp.dot(g, wv[h].astype(matmul_dtype), preferred_element_type=jnp.float32)
        tp = jnp.dot(t, wt[h].astype(matmul_dtype), preferred_element_type=jnp.float32)
        s = jnp.einsum('bnd,bmd->bnm', q, k) / jnp.sqrt(jnp.float32(Dh))
        s = jnp.where(mask[:, None, :] > 0.5, -1e9, s)
        p = jax.nn.softmax(s, axis=-1)
        gl_heads.append(jnp.einsum('bnm,bmd->bnd', p, v))
        tp_heads.append(tp)
    return (jnp.concatenate(gl_heads, axis=-1),
            jnp.concatenate(tp_heads, axis=-1))


if __name__ == "__main__":
    # Small shapes consistent with the module.
    B, Nt, Ng = 2, 8, 16          # batch, topic-seq, global-context-seq
    in_dim, out_dim, num_heads = 32, 16, 4

    key = jax.random.PRNGKey(0)
    k1, k2, k3, k4, k5, k6 = jax.random.split(key, 6)

    topic = jax.random.normal(k1, (B, Nt, in_dim), dtype=jnp.float32)
    glob = jax.random.normal(k2, (B, Ng, in_dim), dtype=jnp.float32)
    # mask: last few global positions of batch 1 are padded
    mask = jnp.zeros((B, Ng), dtype=jnp.float32).at[1, Ng - 4:].set(1.0)

    scale = 1.0 / jnp.sqrt(jnp.float32(in_dim))
    wq = jax.random.normal(k3, (num_heads, in_dim, out_dim), dtype=jnp.float32) * scale
    wk = jax.random.normal(k4, (num_heads, in_dim, out_dim), dtype=jnp.float32) * scale
    wv = jax.random.normal(k5, (num_heads, in_dim, out_dim), dtype=jnp.float32) * scale
    wt = jax.random.normal(k6, (num_heads, in_dim, out_dim), dtype=jnp.float32) * scale

    gl, tp = jax.jit(multi_head_layer)(topic, glob, mask, wq, wk, wv, wt)
    gl = jax.block_until_ready(gl)
    tp = jax.block_until_ready(tp)

    assert gl.shape == (B, Nt, num_heads * out_dim)
    assert tp.shape == (B, Nt, num_heads * out_dim)

    # Tight check vs. a reference with identical bf16 projection-operand rounding.
    gl_bf, tp_bf = _reference(topic, glob, mask, wq, wk, wv, wt, jnp.bfloat16)
    assert jnp.allclose(gl, gl_bf, atol=2e-3, rtol=2e-3)
    assert jnp.allclose(tp, tp_bf, atol=2e-3, rtol=2e-3)

    # Loose check vs. the full-f32 reference; the only difference is the bf16
    # rounding of the MXU matmul operands (standard TPU practice).
    gl_ref, tp_ref = _reference(topic, glob, mask, wq, wk, wv, wt)
    assert jnp.allclose(gl, gl_ref, atol=5e-2, rtol=5e-2)
    assert jnp.allclose(tp, tp_ref, atol=5e-2, rtol=5e-2)

    print("KERNEL_OK")
</pallas_src>

<mosaic_0001>
module attributes {stable_mosaic.version = 11 : i64} {
  func.func @_fused_kernel(%arg0: memref<16x32xbf16, #tpu.memory_space<vmem>>, %arg1: memref<32x32xbf16, #tpu.memory_space<vmem>>, %arg2: memref<2x1x16xf32, #tpu.memory_space<vmem>>, %arg3: memref<32x256xbf16, #tpu.memory_space<vmem>>, %arg4: memref<2x8x128xf32, #tpu.memory_space<vmem>>) attributes {dimension_semantics = [], scalar_prefetch = 0 : i64, scratch_operands = 0 : i64, tpu.core_type = #tpu.core_type<tc>} {
    %c0 = arith.constant 0 : index
    %c0_0 = arith.constant 0 : index
    %0 = vector.load %arg0[%c0, %c0_0] : memref<16x32xbf16, #tpu.memory_space<vmem>>, vector<16x32xbf16>
    %c0_1 = arith.constant 0 : index
    %c0_2 = arith.constant 0 : index
    %1 = vector.load %arg1[%c0_1, %c0_2] : memref<32x32xbf16, #tpu.memory_space<vmem>>, vector<32x32xbf16>
    %2 = tpu.concatenate %0, %1 in 0 : vector<16x32xbf16>, vector<32x32xbf16> -> vector<48x32xbf16>
    %c0_3 = arith.constant 0 : index
    %c0_4 = arith.constant 0 : index
    %3 = vector.load %arg3[%c0_3, %c0_4] : memref<32x256xbf16, #tpu.memory_space<vmem>>, vector<32x256xbf16>
    %cst = arith.constant dense<0.000000e+00> : vector<48x256xf32>
    %4 = tpu.matmul %2, %3, %cst {dimension_numbers = #tpu.dot_dimension_numbers<[1], [0], [0], [1], [0, 0, 1, 1], [], []>} : vector<48x32xbf16>, vector<32x256xbf16>, vector<48x256xf32> -> vector<48x256xf32>
    %5 = vector.extract_strided_slice %4 {offsets = [0, 0], sizes = [16, 256], strides = [1, 1]} : vector<48x256xf32> to vector<16x256xf32>
    %6 = vector.extract_strided_slice %4 {offsets = [16, 0], sizes = [32, 256], strides = [1, 1]} : vector<48x256xf32> to vector<32x256xf32>
    %7 = vector.extract_strided_slice %5 {offsets = [0, 64], sizes = [16, 64], strides = [1, 1]} : vector<16x256xf32> to vector<16x64xf32>
    %8 = vector.shape_cast %7 : vector<16x64xf32> to vector<2x8x64xf32>
    %c0_5 = arith.constant 0 : index
    %c0_6 = arith.constant 0 : index
    %c0_7 = arith.constant 0 : index
    %9 = vector.load %arg2[%c0_5, %c0_6, %c0_7] : memref<2x1x16xf32, #tpu.memory_space<vmem>>, vector<2x1x16xf32>
    %cst_8 = arith.constant 5.000000e-01 : f32
    %10 = vector.broadcast %cst_8 : f32 to vector<2x1x16xf32>
    %11 = arith.cmpf ogt, %9, %10 : vector<2x1x16xf32>
    %cst_9 = arith.constant -1.000000e+09 : f32
    %cst_10 = arith.constant 0.000000e+00 : f32
    %12 = vector.broadcast %cst_9 : f32 to vector<2x1x16xf32>
    %13 = vector.broadcast %cst_10 : f32 to vector<2x1x16xf32>
    %14 = arith.select %11, %12, %13 : vector<2x1x16xi1>, vector<2x1x16xf32>
    %15 = vector.shape_cast %14 : vector<2x1x16xf32> to vector<2x1x16xf32>
    %16 = vector.broadcast %15 : vector<2x1x16xf32> to vector<2x8x16xf32>
    %17 = vector.extract_strided_slice %5 {offsets = [0, 0], sizes = [16, 16], strides = [1, 1]} : vector<16x256xf32> to vector<16x16xf32>
    %18 = vector.shape_cast %17 : vector<16x16xf32> to vector<2x8x16xf32>
    %19 = vector.extract_strided_slice %6 {offsets = [0, 128], sizes = [32, 16], strides = [1, 1]} : vector<32x256xf32> to vector<32x16xf32>
    %20 = vector.shape_cast %19 : vector<32x16xf32> to vector<2x16x16xf32>
    %21 = vector.extract_strided_slice %6 {offsets = [0, 192], sizes = [32, 16], strides = [1, 1]} : vector<32x256xf32> to vector<32x16xf32>
    %22 = vector.shape_cast %21 : vector<32x16xf32> to vector<2x16x16xf32>
    "tpu.trace_start"() <{level = 10 : i32, message = "bnd,bmd->bnm"}> : () -> ()
    %cst_11 = arith.constant dense<0.000000e+00> : vector<2x8x16xf32>
    %23 = tpu.matmul %18, %20, %cst_11 {dimension_numbers = #tpu.dot_dimension_numbers<[2], [2], [1], [1], [0, 0, 0, 1, 1, 1], [0], [0]>} : vector<2x8x16xf32>, vector<2x16x16xf32>, vector<2x8x16xf32> -> vector<2x8x16xf32>
    "tpu.trace_stop"() : () -> ()
    %cst_12 = arith.constant 2.500000e-01 : f32
    %24 = vector.broadcast %cst_12 : f32 to vector<2x8x16xf32>
    %25 = arith.mulf %23, %24 : vector<2x8x16xf32>
    %26 = arith.addf %25, %16 : vector<2x8x16xf32>
    %cst_13 = arith.constant dense<0xFF800000> : vector<2x8xf32>
    %27 = vector.multi_reduction <maximumf>, %26, %cst_13 [2] : vector<2x8x16xf32> to vector<2x8xf32>
    %28 = vector.shape_cast %27 : vector<2x8xf32> to vector<2x8x1xf32>
    %29 = vector.broadcast %28 : vector<2x8x1xf32> to vector<2x8x16xf32>
    %30 = arith.subf %26, %29 : vector<2x8x16xf32>
    %31 = math.exp %30 : vector<2x8x16xf32>
    %cst_14 = arith.constant dense<0.000000e+00> : vector<2x8xf32>
    %32 = vector.multi_reduction <add>, %31, %cst_14 [2] : vector<2x8x16xf32> to vector<2x8xf32>
    %33 = vector.shape_cast %32 : vector<2x8xf32> to vector<2x8x1xf32>
    %34 = tpu.reciprocal %33 : vector<2x8x1xf32> -> vector<2x8x1xf32>
    %35 = vector.broadcast %34 : vector<2x8x1xf32> to vector<2x8x16xf32>
    %36 = arith.mulf %31, %35 : vector<2x8x16xf32>
    "tpu.trace_start"() <{level = 10 : i32, message = "bnm,bmd->bnd"}> : () -> ()
    %cst_15 = arith.constant dense<0.000000e+00> : vector<2x8x16xf32>
    %37 = tpu.matmul %36, %22, %cst_15 {dimension_numbers = #tpu.dot_dimension_numbers<[2], [1], [1], [2], [0, 0, 0, 1, 1, 2], [0], [0]>} : vector<2x8x16xf32>, vector<2x16x16xf32>, vector<2x8x16xf32> -> vector<2x8x16xf32>
    "tpu.trace_stop"() : () -> ()
    %38 = vector.extract_strided_slice %5 {offsets = [0, 16], sizes = [16, 16], strides = [1, 1]} : vector<16x256xf32> to vector<16x16xf32>
    %39 = vector.shape_cast %38 : vector<16x16xf32> to vector<2x8x16xf32>
    %40 = vector.extract_strided_slice %6 {offsets = [0, 144], sizes = [32, 16], strides = [1, 1]} : vector<32x256xf32> to vector<32x16xf32>
    %41 = vector.shape_cast %40 : vector<32x16xf32> to vector<2x16x16xf32>
    %42 = vector.extract_strided_slice %6 {offsets = [0, 208], sizes = [32, 16], strides = [1, 1]} : vector<32x256xf32> to vector<32x16xf32>
    %43 = vector.shape_cast %42 : vector<32x16xf32> to vector<2x16x16xf32>
    "tpu.trace_start"() <{level = 10 : i32, message = "bnd,bmd->bnm"}> : () -> ()
    %cst_16 = arith.constant dense<0.000000e+00> : vector<2x8x16xf32>
    %44 = tpu.matmul %39, %41, %cst_16 {dimension_numbers = #tpu.dot_dimension_numbers<[2], [2], [1], [1], [0, 0, 0, 1, 1, 1], [0], [0]>} : vector<2x8x16xf32>, vector<2x16x16xf32>, vector<2x8x16xf32> -> vector<2x8x16xf32>
    "tpu.trace_stop"() : () -> ()
    %cst_17 = arith.constant 2.500000e-01 : f32
    %45 = vector.broadcast %cst_17 : f32 to vector<2x8x16xf32>
    %46 = arith.mulf %44, %45 : vector<2x8x16xf32>
    %47 = arith.addf %46, %16 : vector<2x8x16xf32>
    %cst_18 = arith.constant dense<0xFF800000> : vector<2x8xf32>
    %48 = vector.multi_reduction <maximumf>, %47, %cst_18 [2] : vector<2x8x16xf32> to vector<2x8xf32>
    %49 = vector.shape_cast %48 : vector<2x8xf32> to vector<2x8x1xf32>
    %50 = vector.broadcast %49 : vector<2x8x1xf32> to vector<2x8x16xf32>
    %51 = arith.subf %47, %50 : vector<2x8x16xf32>
    %52 = math.exp %51 : vector<2x8x16xf32>
    %cst_19 = arith.constant dense<0.000000e+00> : vector<2x8xf32>
    %53 = vector.multi_reduction <add>, %52, %cst_19 [2] : vector<2x8x16xf32> to vector<2x8xf32>
    %54 = vector.shape_cast %53 : vector<2x8xf32> to vector<2x8x1xf32>
    %55 = tpu.reciprocal %54 : vector<2x8x1xf32> -> vector<2x8x1xf32>
    %56 = vector.broadcast %55 : vector<2x8x1xf32> to vector<2x8x16xf32>
    %57 = arith.mulf %52, %56 : vector<2x8x16xf32>
    "tpu.trace_start"() <{level = 10 : i32, message = "bnm,bmd->bnd"}> : () -> ()
    %cst_20 = arith.constant dense<0.000000e+00> : vector<2x8x16xf32>
    %58 = tpu.matmul %57, %43, %cst_20 {dimension_numbers = #tpu.dot_dimension_numbers<[2], [1], [1], [2], [0, 0, 0, 1, 1, 2], [0], [0]>} : vector<2x8x16xf32>, vector<2x16x16xf32>, vector<2x8x16xf32> -> vector<2x8x16xf32>
    "tpu.trace_stop"() : () -> ()
    %59 = vector.extract_strided_slice %5 {offsets = [0, 32], sizes = [16, 16], strides = [1, 1]} : vector<16x256xf32> to vector<16x16xf32>
    %60 = vector.shape_cast %59 : vector<16x16xf32> to vector<2x8x16xf32>
    %61 = vector.extract_strided_slice %6 {offsets = [0, 160], sizes = [32, 16], strides = [1, 1]} : vector<32x256xf32> to vector<32x16xf32>
    %62 = vector.shape_cast %61 : vector<32x16xf32> to vector<2x16x16xf32>
    %63 = vector.extract_strided_slice %6 {offsets = [0, 224], sizes = [32, 16], strides = [1, 1]} : vector<32x256xf32> to vector<32x16xf32>
    %64 = vector.shape_cast %63 : vector<32x16xf32> to vector<2x16x16xf32>
    "tpu.trace_start"() <{level = 10 : i32, message = "bnd,bmd->bnm"}> : () -> ()
    %cst_21 = arith.constant dense<0.000000e+00> : vector<2x8x16xf32>
    %65 = tpu.matmul %60, %62, %cst_21 {dimension_numbers = #tpu.dot_dimension_numbers<[2], [2], [1], [1], [0, 0, 0, 1, 1, 1], [0], [0]>} : vector<2x8x16xf32>, vector<2x16x16xf32>, vector<2x8x16xf32> -> vector<2x8x16xf32>
    "tpu.trace_stop"() : () -> ()
    %cst_22 = arith.constant 2.500000e-01 : f32
    %66 = vector.broadcast %cst_22 : f32 to vector<2x8x16xf32>
    %67 = arith.mulf %65, %66 : vector<2x8x16xf32>
    %68 = arith.addf %67, %16 : vector<2x8x16xf32>
    %cst_23 = arith.constant dense<0xFF800000> : vector<2x8xf32>
    %69 = vector.multi_reduction <maximumf>, %68, %cst_23 [2] : vector<2x8x16xf32> to vector<2x8xf32>
    %70 = vector.shape_cast %69 : vector<2x8xf32> to vector<2x8x1xf32>
    %71 = vector.broadcast %70 : vector<2x8x1xf32> to vector<2x8x16xf32>
    %72 = arith.subf %68, %71 : vector<2x8x16xf32>
    %73 = math.exp %72 : vector<2x8x16xf32>
    %cst_24 = arith.constant dense<0.000000e+00> : vector<2x8xf32>
    %74 = vector.multi_reduction <add>, %73, %cst_24 [2] : vector<2x8x16xf32> to vector<2x8xf32>
    %75 = vector.shape_cast %74 : vector<2x8xf32> to vector<2x8x1xf32>
    %76 = tpu.reciprocal %75 : vector<2x8x1xf32> -> vector<2x8x1xf32>
    %77 = vector.broadcast %76 : vector<2x8x1xf32> to vector<2x8x16xf32>
    %78 = arith.mulf %73, %77 : vector<2x8x16xf32>
    "tpu.trace_start"() <{level = 10 : i32, message = "bnm,bmd->bnd"}> : () -> ()
    %cst_25 = arith.constant dense<0.000000e+00> : vector<2x8x16xf32>
    %79 = tpu.matmul %78, %64, %cst_25 {dimension_numbers = #tpu.dot_dimension_numbers<[2], [1], [1], [2], [0, 0, 0, 1, 1, 2], [0], [0]>} : vector<2x8x16xf32>, vector<2x16x16xf32>, vector<2x8x16xf32> -> vector<2x8x16xf32>
    "tpu.trace_stop"() : () -> ()
    %80 = vector.extract_strided_slice %5 {offsets = [0, 48], sizes = [16, 16], strides = [1, 1]} : vector<16x256xf32> to vector<16x16xf32>
    %81 = vector.shape_cast %80 : vector<16x16xf32> to vector<2x8x16xf32>
    %82 = vector.extract_strided_slice %6 {offsets = [0, 176], sizes = [32, 16], strides = [1, 1]} : vector<32x256xf32> to vector<32x16xf32>
    %83 = vector.shape_cast %82 : vector<32x16xf32> to vector<2x16x16xf32>
    %84 = vector.extract_strided_slice %6 {offsets = [0, 240], sizes = [32, 16], strides = [1, 1]} : vector<32x256xf32> to vector<32x16xf32>
    %85 = vector.shape_cast %84 : vector<32x16xf32> to vector<2x16x16xf32>
    "tpu.trace_start"() <{level = 10 : i32, message = "bnd,bmd->bnm"}> : () -> ()
    %cst_26 = arith.constant dense<0.000000e+00> : vector<2x8x16xf32>
    %86 = tpu.matmul %81, %83, %cst_26 {dimension_numbers = #tpu.dot_dimension_numbers<[2], [2], [1], [1], [0, 0, 0, 1, 1, 1], [0], [0]>} : vector<2x8x16xf32>, vector<2x16x16xf32>, vector<2x8x16xf32> -> vector<2x8x16xf32>
    "tpu.trace_stop"() : () -> ()
    %cst_27 = arith.constant 2.500000e-01 : f32
    %87 = vector.broadcast %cst_27 : f32 to vector<2x8x16xf32>
    %88 = arith.mulf %86, %87 : vector<2x8x16xf32>
    %89 = arith.addf %88, %16 : vector<2x8x16xf32>
    %cst_28 = arith.constant dense<0xFF800000> : vector<2x8xf32>
    %90 = vector.multi_reduction <maximumf>, %89, %cst_28 [2] : vector<2x8x16xf32> to vector<2x8xf32>
    %91 = vector.shape_cast %90 : vector<2x8xf32> to vector<2x8x1xf32>
    %92 = vector.broadcast %91 : vector<2x8x1xf32> to vector<2x8x16xf32>
    %93 = arith.subf %89, %92 : vector<2x8x16xf32>
    %94 = math.exp %93 : vector<2x8x16xf32>
    %cst_29 = arith.constant dense<0.000000e+00> : vector<2x8xf32>
    %95 = vector.multi_reduction <add>, %94, %cst_29 [2] : vector<2x8x16xf32> to vector<2x8xf32>
    %96 = vector.shape_cast %95 : vector<2x8xf32> to vector<2x8x1xf32>
    %97 = tpu.reciprocal %96 : vector<2x8x1xf32> -> vector<2x8x1xf32>
    %98 = vector.broadcast %97 : vector<2x8x1xf32> to vector<2x8x16xf32>
    %99 = arith.mulf %94, %98 : vector<2x8x16xf32>
    "tpu.trace_start"() <{level = 10 : i32, message = "bnm,bmd->bnd"}> : () -> ()
    %cst_30 = arith.constant dense<0.000000e+00> : vector<2x8x16xf32>
    %100 = tpu.matmul %99, %85, %cst_30 {dimension_numbers = #tpu.dot_dimension_numbers<[2], [1], [1], [2], [0, 0, 0, 1, 1, 2], [0], [0]>} : vector<2x8x16xf32>, vector<2x16x16xf32>, vector<2x8x16xf32> -> vector<2x8x16xf32>
    "tpu.trace_stop"() : () -> ()
    %101 = tpu.concatenate %37, %58, %79, %100, %8 in 2 : vector<2x8x16xf32>, vector<2x8x16xf32>, vector<2x8x16xf32>, vector<2x8x16xf32>, vector<2x8x64xf32> -> vector<2x8x128xf32>
    %c0_31 = arith.constant 0 : index
    %c0_32 = arith.constant 0 : index
    %c0_33 = arith.constant 0 : index
    %102 = vector.load %arg4[%c0_31, %c0_32, %c0_33] : memref<2x8x128xf32, #tpu.memory_space<vmem>>, vector<2x8x128xf32>
    tpu.vector_store %arg4[%c0_31, %c0_32, %c0_33], %101 {strides = array<i32>} : memref<2x8x128xf32, #tpu.memory_space<vmem>>, vector<2x8x128xf32>,
    return
  }
}

</mosaic_0001>

<bundles_post_ra>
// kernel: multi_head_layer.1
= control target key start
LH: loop header
LB: loop body
LE: loop exit
PB: predicated region body
PF: predicated region fallthrough
CT: control target
= control target key end

     0   :  { %v1955_v1 = vmov 0   ;;  %vm63_vm0 = vcmask 261120   ;;  %v1956_v8 = vmov 0.0|0.0   ;;  %vm1957_vm1 = vmmov 0   ;;  %s1962_s6 = smov 96   ;;  %s1963_s7 = smov 32   ;;  %s2209_s3 = inlined_call_operand.vmem [shape: bf16[32,256], index: 3, kind: input, shape index: {}]   ;;  %s2210_s0 = inlined_call_operand.vmem [shape: bf16[16,32], index: 0, kind: input, shape index: {}]   ;;  %s2211_s1 = inlined_call_operand.vmem [shape: bf16[32,32], index: 1, kind: input, shape index: {}]   ;;  %s2212_s2 = inlined_call_operand.vmem [shape: f32[2,1,16], index: 2, kind: input, shape index: {}]   ;;  %s2213_s4 = inlined_call_operand.vmem [shape: f32[2,8,128], index: 4, kind: output, shape index: {}]  }
   0x1   :  { %v1914_v0 = vld [vmem:[%s2209_s3 + $0x4] ss:$8 sps:$4 sm:$0xff]   ;;  %105 = vmatprep.mubr.bf16.mxu0 %v1955_v1  ;;  %v1916_v2 = vld [vmem:[%s2209_s3] ss:$8 sps:$4 sm:$0xff]   ;;  %v1917_v3 = vld [vmem:[%s2209_s3 + $0x14] ss:$8 sps:$4 sm:$0xff]   ;;  %1777 = vmatprep.subr.bf16.mxu1 %v1956_v8  ;;  %v138_v32 = vlaneseq }
   0x2   :  { %73 = vmatprep.subr.bf16.mxu0 %v1914_v0  ;;  %v1919_v4 = vld [vmem:[%s2209_s3 + $0x10] ss:$8 sps:$4 sm:$0xff]   ;;  %v1920_v5 = vld [vmem:[%s2210_s0] sm:$0xff]   ;;  %v1922_v7 = vld [vmem:[%s2211_s1 + $0x8] sm:$0xff]   ;;  %v1958_v9 = vmov 0.0   ;;  %vm148_vm2 = vcmask 130048  }
   0x3   :  { %74 = vmatpush1.bf16.msra.mxu0 %v1916_v2  ;;  %v1921_v6 = vld [vmem:[%s2211_s1] sm:$0xff]   ;;  %1669 = vmatprep.mubr.msk.f32.mxu1 %vm1957_vm1, %v1958_v9  ;;  %vm2027_vm3 = vmpackc.low %vm148_vm2, %vm148_vm2  ;;  %s1959_s0 = smov 64   ;;  %s1960_s1 = smov 112   ;;  %v139_v34 = vshrl.u32 %v138_v32, 7  ;;  %vm1563_vm6 = vcmask 392192   ;;  %vm1566_vm7 = vcmask 523264  }
   0x4   :  { %75 = vmatprep.subr.bf16.mxu0 %v1917_v3  ;;  %v130_v33 = vld [vmem:[%s2212_s2] sm:$0x1]  ;;  %v131_v37 = vld [vmem:[%s2212_s2 + $0x1] sm:$0x1]  ;;  %s1961_s2 = smov 48   ;;  %s1964_s8 = smov 80  }
   0x5   :  { %vm132_vm4 = vcmp.gt.f32.partialorder %v130_v33, 0.5  ;;  %v140_v35 = vsub.s32 0, %v139_v34  ;;  %vm133_vm5 = vcmp.gt.f32.partialorder %v131_v37, 0.5  ;;  %s1965_s9 = smov 16  }
   0x6   :  { %v134_v36 = vsel %vm132_vm4, -1e+09, %v1958_v9  ;;  %v135_v43 = vsel %vm133_vm5, -1e+09, %v1958_v9 }
   0x7   :  { %76 = vmatpush1.bf16.msra.mxu0 %v1919_v4  ;;  %v2065_v38 = vrot.slane %v134_v36, %v140_v35  ;;  %v2070_v45 = vrot.slane %v135_v43, %v140_v35 }
   0x8   :  { %1791 = vmatprep.subr.bf16.mxu0 %v1956_v8 }
   0xa   :  { %1582 = vmatmul.mubr.msk.bf16.vlgmr.msra.gmra.mrb[0].mxu0 %vm63_vm0, %v1920_v5 }
   0xb   :  { %113 = vmatprep.mubr.bf16.mxu0 %v1955_v1 }
  0x12   :  { %1583 = vmatmul.mubr.msk.bf16.gmra.mrb[4].mxu0 %vm63_vm0, %v1921_v6 }
  0x13   :  { %121 = vmatprep.mubr.bf16.mxu0 %v1955_v1 }
  0x1a   :  { %1584 = vmatmul.mubr.msk.bf16.gmra.mrb[8].mxu0 %vm63_vm0, %v1922_v7 }
  0x1b   :  { %1697 = vmatprep.mubr.msk.f32.mxu0 %vm1957_vm1, %v1958_v9 }
  0xdd   :  { %v2021_v10 = vpop.f32.mrb[0].mxu0 }
  0xde   :  { %v109_v11 = vpop.f32.mrb[1].mxu0 }
  0xdf   :  { %v2023_v12 = vpop.f32.mrb[2].mxu0 }
  0xe0   :  { %v112_v13 = vpop.f32.mrb[3].mxu0 }
  0xe5   :  { %v115_v14 = vpop.f32.mrb[4].mxu0 }
  0xe6   :  { %v116_v15 = vpop.f32.mrb[5].mxu0 }
  0xe7   :  { %v118_v16 = vpop.f32.mrb[6].mxu0 }
  0xe8   :  { %v119_v17 = vpop.f32.mrb[7].mxu0 }
  0xe9   :  { %v1778_v19 = vpack.c.bf16 %v119_v17, %v116_v15  ;;  %v2031_v20 = vpack.i.bf16 %v119_v17, %v116_v15 }
  0xeb   :  { %1780 = vmatpush3.bf16.xpose.msk.msra.mxu1 %vm2027_vm3, %v1778_v19 }
  0xec   :  { %1781 = vmatprep.subr.bf16.mxu1 %v1956_v8 }
  0xed   :  { %v123_v21 = vpop.f32.mrb[8].mxu0 }
  0xee   :  { %v124_v22 = vpop.f32.mrb[9].mxu0 }
  0xef   :  { %v126_v23 = vpop.f32.mrb[10].mxu0 }
  0xf0   :  { %v127_v24 = vpop.f32.mrb[11].mxu0 }
  0xf1   :  { %v2036_v25 = vpack.i.bf16 %v127_v24, %v124_v22  ;;  %v1782_v26 = vpack.c.bf16 %v127_v24, %v124_v22 }
  0xf2   :  { %1670 = vmatmul.mubr.msk.f32.vlgmr.msra.gmra.mrb[0].mxu1 %vm148_vm2, %v2021_v10 }
  0xf3   :  { %1850 = vrot.lane.b32.xlu1 %v2036_v25, %s1959_s0  ;;  %1784 = vmatpush3.bf16.xpose.msk.msra.mxu1 %vm2027_vm3, %v1782_v26 }
  0xf4   :  { %1676 = vmatprep.mubr.msk.f32.mxu1 %vm1957_vm1, %v1958_v9  ;;  %1785 = vmatprep.subr.bf16.mxu1 %v1956_v8 }
  0xf7   :  { %1855 = vrot.lane.b32.xlu1 %v2031_v20, %s1960_s1 }
  0xfa   :  { %1677 = vmatmul.mubr.msk.f32.vlgmr.msra.gmra.mrb[2].mxu1 %vm148_vm2, %v2023_v12 }
  0xfb   :  { %1683 = vmatprep.mubr.msk.f32.mxu1 %vm1957_vm1, %v1958_v9 }
 0x165   :  { %v2053_v27 = vpop.permute.xlu1 %1850 }
 0x166   :  { %v1853_v3 = vunpack.i.h.bf16 %v2053_v27  ;;  %v1852_v4 = vunpack.i.l.bf16 %v2053_v27 }
 0x168   :  { %v1789_v7 = vpack.c.bf16 %v1853_v3, %v1852_v4 }
 0x169   :  { %v1856_v28 = vpop.permute.xlu1 %1855 }
 0x16a   :  { %v1858_v29 = vunpack.i.h.bf16 %v1856_v28  ;;  %v1857_v30 = vunpack.i.l.bf16 %v1856_v28 }
 0x16c   :  { %v1792_v31 = vpack.c.bf16 %v1858_v29, %v1857_v30 }
 0x16e   :  { %1794 = vmatpush3.bf16.xpose.msk.msra.mxu0 %vm2027_vm3, %v1792_v31 }
 0x16f   :  { %1799 = vmatprep.subr.bf16.mxu0 %v1956_v8 }
 0x1c5   :  { %v224_v39 = vpop.f32.mrb[0].mxu1 }
 0x1c6   :  { %v307_v40 = vmul.f32 0.25, %v224_v39  ;;  %v1671_v41 = vpop.f32.mrb[1].mxu1 }
 0x1c8   :  { %v309_v42 = vadd.f32 %v307_v40, %v2065_v38 }
 0x1ca   :  { %v311_v44 = vsel %vm148_vm2, %v309_v42, -inf }
 0x1cb   :  { %312 = vmax.xlane.f32.xlu0 %v311_v44 }
 0x1cd   :  { %v303_v46 = vpop.f32.mrb[2].mxu1 }
 0x1ce   :  { %v308_v47 = vmul.f32 0.25, %v303_v46  ;;  %v1678_v48 = vpop.f32.mrb[3].mxu1 }
 0x1d0   :  { %v310_v49 = vadd.f32 %v308_v47, %v2070_v45 }
 0x1d2   :  { %v314_v50 = vsel %vm148_vm2, %v310_v49, -inf }
 0x1d3   :  { %315 = vmax.xlane.f32.xlu0 %v314_v50 }
 0x1e9   :  { %1845 = vrot.lane.b32.xlu0 %v2031_v20, %s1959_s0 }
 0x1ed   :  { %491 = vrot.lane.b32.xlu0 %v2021_v10, %s1960_s1 }
 0x258   :  { %v313_v51 = vpop.xlane.xlu0 %312 }
 0x259   :  { %v317_v52 = vsub.f32 %v309_v42, %v313_v51 }
 0x25b   :  { %v319_v53 = vmul.f32 1.442695, %v317_v52 }
 0x25d   :  { %1923 = vpow2.f32 %v319_v53 }
 0x260   :  { %v316_v54 = vpop.xlane.xlu0 %315 }
 0x261   :  { %v318_v62 = vsub.f32 %v310_v49, %v316_v54 }
 0x263   :  { %v321_v63 = vmul.f32 1.442695, %v318_v62 }
 0x264   :  { %v1846_v55 = vpop.permute.xlu0 %1845 }
 0x265   :  { %v1848_v56 = vunpack.i.h.bf16 %v1846_v55  ;;  %v1847_v57 = vunpack.i.l.bf16 %v1846_v55  ;;  %1925 = vpow2.f32 %v321_v63 }
 0x267   :  { %v1924_v58 = vpop.eup %1923  ;;  %v1786_v59 = vpack.c.bf16 %v1848_v56, %v1847_v57 }
 0x268   :  { %v492_v60 = vpop.permute.xlu0 %491  ;;  %v323_v61 = vsel %vm148_vm2, %v1924_v58, 0.0 }
 0x269   :  { %324 = vadd.xlane.f32.xlu1 %v323_v61  ;;  %1787 = vmatpush3.bf16.msra.mxu1 %v1786_v59 }
 0x26a   :  { %1698 = vmatmul.mubr.msk.f32.vlgmr.msra.gmra.mrb[12].mxu0 %vm148_vm2, %v492_v60  ;;  %1788 = vmatprep.subr.bf16.mxu1 %v1956_v8 }
 0x26b   :  { %1711 = vmatprep.mubr.msk.f32.mxu0 %vm1957_vm1, %v1958_v9 }
 0x26f   :  { %v1926_v0 = vpop.eup %1925 }
 0x270   :  { %v326_v1 = vsel %vm148_vm2, %v1926_v0, 0.0 }
 0x27a   :  { %1860 = vrot.lane.b32.xlu1 %v2036_v25, %s1960_s1 }
 0x29e   :  { %327 = vadd.xlane.f32.xlu1 %v326_v1 }
 0x2af   :  { %573 = vrot.lane.b32.xlu1 %v2023_v12, %s1960_s1 }
 0x2f6   :  { %v325_v2 = vpop.xlane.xlu1 %324 }
 0x2f7   :  { %1927 = vrcp.f32 %v325_v2 }
 0x2fa   :  { %v1861_v11 = vpop.permute.xlu1 %1860 }
 0x2fb   :  { %v1863_v14 = vunpack.i.h.bf16 %v1861_v11  ;;  %v1862_v15 = vunpack.i.l.bf16 %v1861_v11 }
 0x2fd   :  { %v1796_v19 = vpack.c.bf16 %v1863_v14, %v1862_v15 }
 0x301   :  { %v1928_v5 = vpop.eup %1927 }
 0x302   :  { %v331_v6 = vmul.f32 %v1928_v5, %v1924_v58 }
 0x304   :  { %1684 = vmatmul.mubr.msk.f32.vlgmr.msra.gmra.mrb[4].mxu1 %vm148_vm2, %v331_v6 }
 0x305   :  { %1790 = vmatpush3.bf16.msra.mxu1 %v1789_v7  ;;  %1690 = vmatprep.mubr.msk.f32.mxu1 %vm1957_vm1, %v1958_v9 }
 0x306   :  { %1795 = vmatprep.subr.bf16.mxu1 %v1956_v8 }
 0x32b   :  { %v328_v13 = vpop.xlane.xlu1 %327 }
 0x32c   :  { %1929 = vrcp.f32 %v328_v13 }
 0x32f   :  { %v574_v24 = vpop.permute.xlu1 %573 }
 0x336   :  { %v1930_v16 = vpop.eup %1929 }
 0x337   :  { %v332_v17 = vmul.f32 %v1930_v16, %v1926_v0 }
 0x339   :  { %1691 = vmatmul.mubr.msk.f32.vlgmr.msra.gmra.mrb[6].mxu1 %vm148_vm2, %v332_v17 }
 0x33a   :  { %1798 = vmatpush3.bf16.xpose.msk.msra.mxu1 %vm2027_vm3, %v1796_v19  ;;  %1704 = vmatprep.mubr.msk.f32.mxu1 %vm1957_vm1, %v1958_v9 }
 0x33b   :  { %1802 = vmatprep.subr.bf16.mxu1 %v1956_v8 }
 0x33d   :  { %v569_v21 = vpop.f32.mrb[12].mxu0 }
 0x33e   :  { %v655_v22 = vmul.f32 0.25, %v569_v21  ;;  %v1699_v23 = vpop.f32.mrb[13].mxu0 }
 0x340   :  { %v657_v26 = vadd.f32 %v655_v22, %v2065_v38 }
 0x341   :  { %1705 = vmatmul.mubr.msk.f32.vlgmr.msra.gmra.mrb[8].mxu1 %vm148_vm2, %v574_v24 }
 0x342   :  { %v659_v27 = vsel %vm148_vm2, %v657_v26, -inf  ;;  %1718 = vmatprep.mubr.msk.f32.mxu1 %vm1957_vm1, %v1958_v9 }
 0x343   :  { %660 = vmax.xlane.f32.xlu0 %v659_v27 }
 0x3d0   :  { %v661_v28 = vpop.xlane.xlu0 %660 }
 0x3d1   :  { %v665_v29 = vsub.f32 %v657_v26, %v661_v28 }
 0x3d3   :  { %v667_v30 = vmul.f32 1.442695, %v665_v29 }
 0x3d5   :  { %1931 = vpow2.f32 %v667_v30 }
 0x3d7   :  { %v2105_v31 = vpop.f32.mrb[4].mxu1 }
 0x3d8   :  { %v1685_v32 = vpop.f32.mrb[5].mxu1 }
 0x3df   :  { %v1932_v33 = vpop.eup %1931 }
 0x3e0   :  { %v671_v34 = vsel %vm148_vm2, %v1932_v33, 0.0 }
 0x3e1   :  { %672 = vadd.xlane.f32.xlu0 %v671_v34 }
 0x40c   :  { %v2108_v35 = vpop.f32.mrb[6].mxu1 }
 0x40d   :  { %v1692_v36 = vpop.f32.mrb[7].mxu1 }
 0x414   :  { %v651_v37 = vpop.f32.mrb[8].mxu1 }
 0x415   :  { %v656_v39 = vmul.f32 0.25, %v651_v37  ;;  %v1706_v40 = vpop.f32.mrb[9].mxu1 }
 0x417   :  { %v658_v41 = vadd.f32 %v656_v39, %v2070_v45 }
 0x419   :  { %v662_v42 = vsel %vm148_vm2, %v658_v41, -inf }
 0x41a   :  { %663 = vmax.xlane.f32.xlu1 %v662_v42 }
 0x42b   :  { %1870 = vrot.lane.b32.xlu1 %v2036_v25, %s1961_s2 }
 0x42f   :  { %1875 = vrot.lane.b32.xlu1 %v2031_v20, %s1962_s6 }
 0x433   :  { %1880 = vrot.lane.b32.xlu1 %v2036_v25, %s1962_s6 }
 0x437   :  { %921 = vrot.lane.b32.xlu1 %v2023_v12, %s1962_s6 }
 0x46e   :  { %v673_v53 = vpop.xlane.xlu0 %672 }
 0x4a7   :  { %v664_v43 = vpop.xlane.xlu1 %663 }
 0x4a8   :  { %v666_v44 = vsub.f32 %v658_v41, %v664_v43 }
 0x4aa   :  { %v669_v46 = vmul.f32 1.442695, %v666_v44 }
 0x4ab   :  { %v1871_v47 = vpop.permute.xlu1 %1870 }
 0x4ac   :  { %1933 = vpow2.f32 %v669_v46  ;;  %v1873_v48 = vunpack.i.h.bf16 %v1871_v47  ;;  %v1872_v49 = vunpack.i.l.bf16 %v1871_v47 }
 0x4ad   :  { %1935 = vrcp.f32 %v673_v53 }
 0x4ae   :  { %v1803_v50 = vpack.c.bf16 %v1873_v48, %v1872_v49 }
 0x4af   :  { %v1876_v54 = vpop.permute.xlu1 %1875 }
 0x4b0   :  { %1804 = vmatpush3.bf16.msra.mxu1 %v1803_v50  ;;  %v1878_v2 = vunpack.i.h.bf16 %v1876_v54  ;;  %v1877_v3 = vunpack.i.l.bf16 %v1876_v54 }
 0x4b1   :  { %1809 = vmatprep.subr.bf16.mxu1 %v1956_v8 }
 0x4b2   :  { %v1806_v6 = vpack.c.bf16 %v1878_v2, %v1877_v3 }
 0x4b3   :  { %v1881_v59 = vpop.permute.xlu1 %1880 }
 0x4b4   :  { %v1883_v62 = vunpack.i.h.bf16 %v1881_v59  ;;  %v1882_v63 = vunpack.i.l.bf16 %v1881_v59 }
 0x4b6   :  { %v1934_v51 = vpop.eup %1933  ;;  %v1810_v5 = vpack.c.bf16 %v1883_v62, %v1882_v63 }
 0x4b7   :  { %v674_v52 = vsel %vm148_vm2, %v1934_v51, 0.0  ;;  %v1936_v60 = vpop.eup %1935  ;;  %v922_v7 = vpop.permute.xlu1 %921 }
 0x4b8   :  { %675 = vadd.xlane.f32.xlu0 %v674_v52  ;;  %v679_v0 = vmul.f32 %v1936_v60, %v1932_v33 }
 0x4ce   :  { %1865 = vrot.lane.b32.xlu0 %v2031_v20, %s1961_s2 }
 0x4d2   :  { %839 = vrot.lane.b32.xlu0 %v2021_v10, %s1962_s6 }
 0x545   :  { %v676_v55 = vpop.xlane.xlu0 %675 }
 0x546   :  { %1937 = vrcp.f32 %v676_v55 }
 0x549   :  { %v1866_v56 = vpop.permute.xlu0 %1865 }
 0x54a   :  { %v1868_v57 = vunpack.i.h.bf16 %v1866_v56  ;;  %v1867_v58 = vunpack.i.l.bf16 %v1866_v56 }
 0x54c   :  { %v1800_v61 = vpack.c.bf16 %v1868_v57, %v1867_v58 }
 0x54d   :  { %v840_v11 = vpop.permute.xlu0 %839 }
 0x54e   :  { %1801 = vmatpush3.bf16.msra.mxu0 %v1800_v61 }
 0x54f   :  { %1805 = vmatprep.subr.bf16.mxu0 %v1956_v8 }
 0x550   :  { %v1938_v1 = vpop.eup %1937 }
 0x551   :  { %v680_v4 = vmul.f32 %v1938_v1, %v1934_v51  ;;  %1712 = vmatmul.mubr.msk.f32.vlgmr.msra.gmra.mrb[14].mxu0 %vm148_vm2, %v679_v0 }
 0x552   :  { %1725 = vmatprep.mubr.msk.f32.mxu0 %vm1957_vm1, %v1958_v9 }
 0x553   :  { %1719 = vmatmul.mubr.msk.f32.vlgmr.msra.gmra.mrb[10].mxu1 %vm148_vm2, %v680_v4 }
 0x554   :  { %1812 = vmatpush3.bf16.xpose.msk.msra.mxu1 %vm2027_vm3, %v1810_v5  ;;  %1732 = vmatprep.mubr.msk.f32.mxu1 %vm1957_vm1, %v1958_v9 }
 0x555   :  { %1816 = vmatprep.subr.bf16.mxu1 %v1956_v8 }
 0x557   :  { %1808 = vmatpush3.bf16.xpose.msk.msra.mxu0 %vm2027_vm3, %v1806_v6 }
 0x558   :  { %1813 = vmatprep.subr.bf16.mxu0 %v1956_v8 }
 0x55b   :  { %1733 = vmatmul.mubr.msk.f32.vlgmr.msra.gmra.mrb[12].mxu1 %vm148_vm2, %v922_v7 }
 0x55c   :  { %1746 = vmatprep.mubr.msk.f32.mxu1 %vm1957_vm1, %v1958_v9 }
 0x55e   :  { %1726 = vmatmul.mubr.msk.f32.vlgmr.msra.gmra.mrb[16].mxu0 %vm148_vm2, %v840_v11 }
 0x55f   :  { %1739 = vmatprep.mubr.msk.f32.mxu0 %vm1957_vm1, %v1958_v9 }
 0x624   :  { %v2141_v13 = vpop.f32.mrb[14].mxu0 }
 0x625   :  { %v1713_v14 = vpop.f32.mrb[15].mxu0 }
 0x626   :  { %v2143_v15 = vpop.f32.mrb[10].mxu1 }
 0x627   :  { %v1720_v16 = vpop.f32.mrb[11].mxu1 }
 0x62e   :  { %v999_v17 = vpop.f32.mrb[12].mxu1 }
 0x62f   :  { %v1004_v19 = vmul.f32 0.25, %v999_v17  ;;  %v1734_v21 = vpop.f32.mrb[13].mxu1 }
 0x631   :  { %v917_v22 = vpop.f32.mrb[16].mxu0  ;;  %v1006_v23 = vadd.f32 %v1004_v19, %v2070_v45 }
 0x632   :  { %v1003_v24 = vmul.f32 0.25, %v917_v22  ;;  %v1727_v26 = vpop.f32.mrb[17].mxu0 }
 0x633   :  { %v1010_v27 = vsel %vm148_vm2, %v1006_v23, -inf }
 0x634   :  { %1011 = vmax.xlane.f32.xlu1 %v1010_v27  ;;  %v1005_v28 = vadd.f32 %v1003_v24, %v2065_v38 }
 0x636   :  { %v1007_v29 = vsel %vm148_vm2, %v1005_v28, -inf }
 0x637   :  { %1008 = vmax.xlane.f32.xlu0 %v1007_v29 }
 0x645   :  { %1890 = vrot.lane.b32.xlu1 %v2036_v25, %s1963_s7 }
 0x649   :  { %1895 = vrot.lane.b32.xlu1 %v2031_v20, %s1964_s8 }
 0x64d   :  { %1900 = vrot.lane.b32.xlu1 %v2036_v25, %s1964_s8 }
 0x651   :  { %1269 = vrot.lane.b32.xlu1 %v2023_v12, %s1964_s8 }
 0x6c1   :  { %v1012_v30 = vpop.xlane.xlu1 %1011 }
 0x6c2   :  { %v1014_v32 = vsub.f32 %v1006_v23, %v1012_v30 }
 0x6c4   :  { %v1009_v33 = vpop.xlane.xlu0 %1008  ;;  %v1017_v40 = vmul.f32 1.442695, %v1014_v32 }
 0x6c5   :  { %v1013_v34 = vsub.f32 %v1005_v28, %v1009_v33  ;;  %v1891_v36 = vpop.permute.xlu1 %1890 }
 0x6c6   :  { %v1893_v37 = vunpack.i.h.bf16 %v1891_v36  ;;  %v1892_v39 = vunpack.i.l.bf16 %v1891_v36 }
 0x6c7   :  { %v1015_v41 = vmul.f32 1.442695, %v1013_v34 }
 0x6c8   :  { %v1817_v42 = vpack.c.bf16 %v1893_v37, %v1892_v39 }
 0x6c9   :  { %1939 = vpow2.f32 %v1015_v41  ;;  %v1896_v49 = vpop.permute.xlu1 %1895 }
 0x6ca   :  { %1818 = vmatpush3.bf16.msra.mxu1 %v1817_v42  ;;  %1941 = vpow2.f32 %v1017_v40  ;;  %v1898_v61 = vunpack.i.h.bf16 %v1896_v49  ;;  %v1897_v62 = vunpack.i.l.bf16 %v1896_v49 }
 0x6cb   :  { %1823 = vmatprep.subr.bf16.mxu1 %v1956_v8 }
 0x6cc   :  { %v1820_v1 = vpack.c.bf16 %v1898_v61, %v1897_v62 }
 0x6cd   :  { %v1901_v54 = vpop.permute.xlu1 %1900 }
 0x6ce   :  { %v1903_v57 = vunpack.i.h.bf16 %v1901_v54  ;;  %v1902_v58 = vunpack.i.l.bf16 %v1901_v54 }
 0x6d0   :  { %v1824_v0 = vpack.c.bf16 %v1903_v57, %v1902_v58 }
 0x6d1   :  { %v1270_v2 = vpop.permute.xlu1 %1269 }
 0x6d3   :  { %v1940_v43 = vpop.eup %1939 }
 0x6d4   :  { %v1019_v44 = vsel %vm148_vm2, %v1940_v43, 0.0  ;;  %v1942_v46 = vpop.eup %1941 }
 0x6d5   :  { %1020 = vadd.xlane.f32.xlu0 %v1019_v44  ;;  %v1022_v47 = vsel %vm148_vm2, %v1942_v46, 0.0 }
 0x6d9   :  { %1023 = vadd.xlane.f32.xlu0 %v1022_v47 }
 0x6ef   :  { %1885 = vrot.lane.b32.xlu0 %v2031_v20, %s1963_s7 }
 0x6f3   :  { %1187 = vrot.lane.b32.xlu0 %v2021_v10, %s1964_s8 }
 0x762   :  { %v1021_v48 = vpop.xlane.xlu0 %1020 }
 0x763   :  { %1943 = vrcp.f32 %v1021_v48 }
 0x766   :  { %v1024_v50 = vpop.xlane.xlu0 %1023 }
 0x767   :  { %1945 = vrcp.f32 %v1024_v50 }
 0x76a   :  { %v1886_v51 = vpop.permute.xlu0 %1885 }
 0x76b   :  { %v1888_v52 = vunpack.i.h.bf16 %v1886_v51  ;;  %v1887_v53 = vunpack.i.l.bf16 %v1886_v51 }
 0x76d   :  { %v1944_v55 = vpop.eup %1943  ;;  %v1814_v56 = vpack.c.bf16 %v1888_v52, %v1887_v53 }
 0x76e   :  { %v1027_v59 = vmul.f32 %v1944_v55, %v1940_v43  ;;  %v1188_v3 = vpop.permute.xlu0 %1187 }
 0x76f   :  { %1815 = vmatpush3.bf16.msra.mxu0 %v1814_v56 }
 0x770   :  { %1819 = vmatprep.subr.bf16.mxu0 %v1956_v8 }
 0x771   :  { %v1946_v60 = vpop.eup %1945 }
 0x772   :  { %v1028_v63 = vmul.f32 %v1946_v60, %v1942_v46  ;;  %1740 = vmatmul.mubr.msk.f32.vlgmr.msra.gmra.mrb[18].mxu0 %vm148_vm2, %v1027_v59 }
 0x773   :  { %1753 = vmatprep.mubr.msk.f32.mxu0 %vm1957_vm1, %v1958_v9 }
 0x774   :  { %1747 = vmatmul.mubr.msk.f32.vlgmr.msra.gmra.mrb[14].mxu1 %vm148_vm2, %v1028_v63 }
 0x775   :  { %1826 = vmatpush3.bf16.xpose.msk.msra.mxu1 %vm2027_vm3, %v1824_v0  ;;  %1760 = vmatprep.mubr.msk.f32.mxu1 %vm1957_vm1, %v1958_v9 }
 0x776   :  { %1830 = vmatprep.subr.bf16.mxu1 %v1956_v8 }
 0x778   :  { %1822 = vmatpush3.bf16.xpose.msk.msra.mxu0 %vm2027_vm3, %v1820_v1 }
 0x779   :  { %1827 = vmatprep.subr.bf16.mxu0 %v1956_v8 }
 0x77c   :  { %1761 = vmatmul.mubr.msk.f32.vlgmr.msra.gmra.mrb[16].mxu1 %vm148_vm2, %v1270_v2 }
 0x77d   :  { %1774 = vmatprep.mubr.msk.f32.mxu1 %vm1957_vm1, %v1958_v9 }
 0x77f   :  { %1754 = vmatmul.mubr.msk.f32.vlgmr.msra.gmra.mrb[20].mxu0 %vm148_vm2, %v1188_v3 }
 0x780   :  { %1767 = vmatprep.mubr.msk.f32.mxu0 %vm1957_vm1, %v1958_v9 }
 0x845   :  { %v1104_v4 = vpop.f32.mrb[18].mxu0 }
 0x846   :  { %v1741_v5 = vpop.f32.mrb[19].mxu0 }
 0x847   :  { %v1183_v6 = vpop.f32.mrb[14].mxu1 }
 0x848   :  { %v1748_v7 = vpop.f32.mrb[15].mxu1 }
 0x84f   :  { %v1347_v18 = vpop.f32.mrb[16].mxu1 }
 0x850   :  { %v1352_v11 = vmul.f32 0.25, %v1347_v18  ;;  %v1762_v14 = vpop.f32.mrb[17].mxu1 }
 0x852   :  { %v1265_v8 = vpop.f32.mrb[20].mxu0  ;;  %v1354_v16 = vadd.f32 %v1352_v11, %v2070_v45 }
 0x853   :  { %v1351_v17 = vmul.f32 0.25, %v1265_v8  ;;  %v1755_v19 = vpop.f32.mrb[21].mxu0 }
 0x854   :  { %v1358_v21 = vsel %vm148_vm2, %v1354_v16, -inf }
 0x855   :  { %1359 = vmax.xlane.f32.xlu1 %v1358_v21  ;;  %v1353_v22 = vadd.f32 %v1351_v17, %v2065_v38 }
 0x857   :  { %v1355_v23 = vsel %vm148_vm2, %v1353_v22, -inf }
 0x858   :  { %1356 = vmax.xlane.f32.xlu0 %v1355_v23 }
 0x866   :  { %1910 = vrot.lane.b32.xlu1 %v2036_v25, %s1965_s9 }
 0x86a   :  { %1537 = vrot.lane.b32.xlu1 %v2141_v13, %s1965_s9 }
 0x86e   :  { %1539 = vrot.lane.b32.xlu1 %v2143_v15, %s1965_s9 }
 0x872   :  { %1547 = vrot.lane.b32.xlu1 %v1183_v6, %s1963_s7 }
 0x8e2   :  { %v1360_v9 = vpop.xlane.xlu1 %1359 }
 0x8e3   :  { %v1362_v45 = vsub.f32 %v1354_v16, %v1360_v9 }
 0x8e5   :  { %v1357_v24 = vpop.xlane.xlu0 %1356  ;;  %v1365_v38 = vmul.f32 1.442695, %v1362_v45 }
 0x8e6   :  { %v1361_v26 = vsub.f32 %v1353_v22, %v1357_v24  ;;  %v1911_v27 = vpop.permute.xlu1 %1910 }
 0x8e7   :  { %v1913_v28 = vunpack.i.h.bf16 %v1911_v27  ;;  %v1912_v29 = vunpack.i.l.bf16 %v1911_v27 }
 0x8e8   :  { %v1363_v30 = vmul.f32 1.442695, %v1361_v26 }
 0x8e9   :  { %v1831_v32 = vpack.c.bf16 %v1913_v28, %v1912_v29 }
 0x8ea   :  { %1947 = vpow2.f32 %v1363_v30  ;;  %v1538_v50 = vpop.permute.xlu1 %1537 }
 0x8eb   :  { %1832 = vmatpush3.bf16.msra.mxu1 %v1831_v32  ;;  %1949 = vpow2.f32 %v1365_v38  ;;  %v1559_v54 = vsel %vm148_vm2, %v2105_v31, %v1538_v50 }
 0x8ee   :  { %v1540_v51 = vpop.permute.xlu1 %1539 }
 0x8ef   :  { %v1560_v57 = vsel %vm148_vm2, %v2108_v35, %v1540_v51 }
 0x8f2   :  { %v1548_v53 = vpop.permute.xlu1 %1547 }
 0x8f3   :  { %v1562_v59 = vsel %vm63_vm0, %v1560_v57, %v1548_v53 }
 0x8f4   :  { %v1948_v25 = vpop.eup %1947 }
 0x8f5   :  { %v1367_v13 = vsel %vm148_vm2, %v1948_v25, 0.0  ;;  %v1950_v33 = vpop.eup %1949 }
 0x8f6   :  { %1368 = vadd.xlane.f32.xlu0 %v1367_v13  ;;  %v1370_v15 = vsel %vm148_vm2, %v1950_v33, 0.0 }
 0x8fa   :  { %1371 = vadd.xlane.f32.xlu0 %v1370_v15 }
 0x910   :  { %1905 = vrot.lane.b32.xlu0 %v2031_v20, %s1965_s9 }
 0x914   :  { %1545 = vrot.lane.b32.xlu0 %v1104_v4, %s1963_s7 }
 0x983   :  { %v1369_v34 = vpop.xlane.xlu0 %1368 }
 0x984   :  { %1951 = vrcp.f32 %v1369_v34 }
 0x987   :  { %v1372_v36 = vpop.xlane.xlu0 %1371 }
 0x988   :  { %1953 = vrcp.f32 %v1372_v36 }
 0x98b   :  { %v1906_v37 = vpop.permute.xlu0 %1905 }
 0x98c   :  { %v1908_v39 = vunpack.i.h.bf16 %v1906_v37  ;;  %v1907_v40 = vunpack.i.l.bf16 %v1906_v37 }
 0x98e   :  { %v1952_v41 = vpop.eup %1951  ;;  %v1828_v42 = vpack.c.bf16 %v1908_v39, %v1907_v40 }
 0x98f   :  { %v1375_v43 = vmul.f32 %v1952_v41, %v1948_v25  ;;  %v1546_v52 = vpop.permute.xlu0 %1545 }
 0x990   :  { %1829 = vmatpush3.bf16.msra.mxu0 %v1828_v42  ;;  %v1561_v55 = vsel %vm63_vm0, %v1559_v54, %v1546_v52 }
 0x992   :  { %v1954_v44 = vpop.eup %1953 }
 0x993   :  { %v1376_v46 = vmul.f32 %v1954_v44, %v1950_v33  ;;  %1768 = vmatmul.mubr.msk.f32.vlgmr.msra.gmra.mrb[22].mxu0 %vm148_vm2, %v1375_v43 }
 0x995   :  { %1775 = vmatmul.mubr.msk.f32.vlgmr.msra.gmra.mrb[18].mxu1 %vm148_vm2, %v1376_v46 }
 0xa66   :  { %v1452_v20 = vpop.f32.mrb[22].mxu0 }
 0xa67   :  { %1553 = vrot.lane.b32.xlu0 %v1452_v20, %s1961_s2  ;;  %v1769_v47 = vpop.f32.mrb[23].mxu0 }
 0xa68   :  { %v1531_v48 = vpop.f32.mrb[18].mxu1 }
 0xa69   :  { %1555 = vrot.lane.b32.xlu1 %v1531_v48, %s1961_s2  ;;  %v1776_v49 = vpop.f32.mrb[19].mxu1 }
 0xad9   :  { %v1554_v56 = vpop.permute.xlu0 %1553 }
 0xada   :  { %v1564_v58 = vsel %vm1563_vm6, %v1561_v55, %v1554_v56 }
 0xadb   :  { %v1567_v60 = vsel %vm1566_vm7, %v1564_v58, %v2021_v10  ;;  %v1556_v61 = vpop.permute.xlu1 %1555 }
 0xadc   :  { %1569 = vst [vmem:[%s2213_s4] sm:$0xff] %v1567_v60  ;;  %v1565_v62 = vsel %vm1563_vm6, %v1562_v59, %v1556_v61 }
 0xadd   :  { %v1568_v31 = vsel %vm1566_vm7, %v1565_v62, %v2023_v12 }
 0xade   :  { %1570 = vst [vmem:[%s2213_s4 + $0x8] sm:$0xff] %v1568_v31 }

</bundles_post_ra>
